<compile_context>
chip_gen: v5e
topology: v5e:2x2
jax: 0.10.0
libtpu: 0.0.40
codegen_flags: <defaults>
</compile_context>

<pallas_src>
import math
from functools import partial

import jax
import jax.numpy as jnp
from jax.experimental import pallas as pl
from jax.experimental.pallas import tpu as pltpu


def _round_up(n, m):
    return ((n + m - 1) // m) * m


def stocha_policy_kernel(obs_ref, w1_ref, w23_ref, b_ref, o_ref, *,
                         act_dim, min_log_std, max_log_std, lipschitz):
    """Fused shared-MLP policy head on one (TB, obs_dim) batch tile.

    obs_ref : (TB, obs_dim) f32   activations (batch-tiled)
    w1_ref  : (obs_dim, H)  bf16  first layer weight, lane-padded to H (multiple of 128)
    w23_ref : (2, H, H)     bf16  stacked [W2 ; W3], zero-padded
    b_ref   : (3, H)        f32   stacked [b1 ; b2 ; b3], zero-padded
    o_ref   : (TB, 2*act_dim) f32 compact output: [mean | std]
    """
    x = obs_ref[...]                                                     # (TB, obs_dim) f32

    # layer 1: relu(x @ W1 + b1)   -- bf16 MXU inputs, f32 accumulate + epilogue
    z = jnp.dot(x.astype(jnp.bfloat16), w1_ref[...],
                preferred_element_type=jnp.float32) + b_ref[0:1, :]
    z = jnp.maximum(z, 0.0)

    # layer 2: relu(z @ W2 + b2)
    z = jnp.dot(z.astype(jnp.bfloat16), w23_ref[0],
                preferred_element_type=jnp.float32) + b_ref[1:2, :]
    z = jnp.maximum(z, 0.0)

    # output layer (identity activation): logits = z @ W3 + b3
    logits = jnp.dot(z.astype(jnp.bfloat16), w23_ref[1],
                     preferred_element_type=jnp.float32) + b_ref[2:3, :]

    # Fused chunk + clamp + exp + concat via a lane-index mask on the full 128-wide tile
    # (cheap VPU/EUP filler under the MXU slack), then store only the 2*act_dim valid
    # columns into the compact output ref.
    #   cols [0, act_dim)         -> action mean (optionally Lipschitz-scaled)
    #   cols [act_dim, 2*act_dim) -> exp(clamp(log_std))   (clip BEFORE exp: keeps ragged
    #                                batch-tile padding rows finite)
    col = jax.lax.broadcasted_iota(jnp.int32, logits.shape, 1)
    mean_part = logits if lipschitz is None else logits * lipschitz
    std_part = jnp.exp(jnp.clip(logits, min_log_std, max_log_std))
    out = jnp.where(col < act_dim, mean_part, std_part)
    o_ref[...] = out[:, : 2 * act_dim].astype(o_ref.dtype)


def _choose_batch_tile(B, batch_tile):
    """>=2 grid steps for large B so ("parallel",) can use both v7x TensorCores."""
    if B <= 256:
        return B
    return min(batch_tile, _round_up(pl.cdiv(B, 2), 8))


def stocha_policy_forward(obs, packed_params, *, act_dim,
                          min_log_std=-20.0, max_log_std=2.0,
                          lipschitz_constant=None,
                          batch_tile=2048):
    """Run the fused StochaPolicy ('mlp_shared') forward pass. Returns (B, 2*act_dim) f32."""
    obs = obs.astype(jnp.float32)
    w1p, w23, bstack = packed_params
    B, obs_dim = obs.shape
    H = w1p.shape[1]                                  # lane-padded hidden / output width
    out_dim = 2 * act_dim

    TB = _choose_batch_tile(B, batch_tile)
    grid = (pl.cdiv(B, TB),)

    kernel = partial(stocha_policy_kernel,
                     act_dim=int(act_dim),
                     min_log_std=float(min_log_std),
                     max_log_std=float(max_log_std),
                     lipschitz=lipschitz_constant)

    # Scheduling hint for XLA around the custom call (cheap, advisory).
    flops = 2 * B * (obs_dim * H + 2 * H * H)
    bytes_accessed = (obs.size * 4           # f32 activations in
                      + w1p.size * 2 + w23.size * 2 + bstack.size * 4   # bf16 W, f32 b
                      + B * out_dim * 4)     # compact f32 output
    cost = pl.CostEstimate(flops=flops, transcendentals=B * H,
                           bytes_accessed=bytes_accessed)

    out = pl.pallas_call(
        kernel,
        out_shape=jax.ShapeDtypeStruct((B, out_dim), jnp.float32),
        grid=grid,
        in_specs=[
            pl.BlockSpec((TB, obs_dim), lambda i: (i, 0)),      # activations: tiled on batch
            pl.BlockSpec(w1p.shape, lambda i: (0, 0)),          # weights: VMEM-resident (bf16)
            pl.BlockSpec(w23.shape, lambda i: (0, 0, 0)),
            pl.BlockSpec(bstack.shape, lambda i: (0, 0)),
        ],
        # Compact output block: last dim == full array dim, so only 2*act_dim columns
        # are ever written back to HBM (no padded-slab round trip, no wrapper slice).
        out_specs=pl.BlockSpec((TB, out_dim), lambda i: (i, 0)),
        compiler_params=pltpu.CompilerParams(
            dimension_semantics=("parallel",),                  # shards batch across TCs (v7x)
            vmem_limit_bytes=32 * 1024 * 1024),                 # covers v5e's 16 MiB default
        cost_estimate=cost,
    )(obs, w1p, w23, bstack)
    return out


def init_params(key, obs_dim, act_dim, hidden_sizes):
    """Raw params mimicking nn.Linear default init (uniform +-1/sqrt(fan_in)).
    Layout: W is (in, out), b is (out,). 'mlp_shared' head -> final width 2*act_dim."""
    sizes = [obs_dim] + list(hidden_sizes) + [2 * act_dim]
    params = []
    for j in range(len(sizes) - 1):
        fan_in, fan_out = sizes[j], sizes[j + 1]
        key, kw, kb = jax.random.split(key, 3)
        bound = 1.0 / math.sqrt(fan_in)
        w = jax.random.uniform(kw, (fan_in, fan_out), jnp.float32, -bound, bound)
        b = jax.random.uniform(kb, (fan_out,), jnp.float32, -bound, bound)
        params.append((w, b))
    return params


def pack_params(raw_params):
    """One-time host-side packing:
       * pad every layer's output width to a multiple of 128 (zero padding keeps the
         math identical),
       * cast weights to bf16 (MXU-native inputs; f32 accumulation in-kernel),
       * stack operands to cut DMA count.
    Returns (W1_pad (obs_dim,H) bf16, W23 (2,H,H) bf16, B_stack (3,H) f32)."""
    (w1, b1), (w2, b2), (w3, b3) = raw_params
    obs_dim, h1 = w1.shape
    h2 = w2.shape[1]
    out_dim = w3.shape[1]
    H = _round_up(max(h1, h2, out_dim), 128)
    # NOTE: weight BlockSpecs are constant-index but still double-buffered; resident
    # weight bytes ~= 2*(2*H*H + obs_dim*H)*2 (bf16). Fine at H=128 (~0.13 MiB); re-derive
    # against v7x's 64 MiB VMEM (and consider pipeline_mode=pl.Buffered(1)) if H grows.

    def pad2(w, rows, cols):
        return jnp.zeros((rows, cols), jnp.float32).at[:w.shape[0], :w.shape[1]].set(w)

    w1p = pad2(w1, obs_dim, H).astype(jnp.bfloat16)
    w2p = pad2(w2, H, H)
    w3p = pad2(w3, H, H)
    w23 = jnp.stack([w2p, w3p], axis=0).astype(jnp.bfloat16)    # (2, H, H) bf16

    bstack = jnp.zeros((3, H), jnp.float32)
    bstack = bstack.at[0, :h1].set(b1)
    bstack = bstack.at[1, :h2].set(b2)
    bstack = bstack.at[2, :out_dim].set(b3)
    return w1p, w23, bstack


def _reference_forward(obs, raw_params, act_dim, min_log_std, max_log_std,
                       lipschitz_constant=None):
    """Pure-JAX f32 reference with exact PyTorch ('mlp_shared') semantics."""
    (w1, b1), (w2, b2), (w3, b3) = raw_params
    h = jnp.maximum(obs @ w1 + b1, 0.0)
    h = jnp.maximum(h @ w2 + b2, 0.0)
    logits = h @ w3 + b3
    mean = logits[:, :act_dim]
    if lipschitz_constant is not None:
        mean = mean * lipschitz_constant
    std = jnp.exp(jnp.clip(logits[:, act_dim:], min_log_std, max_log_std))
    return jnp.concatenate([mean, std], axis=-1)


if __name__ == "__main__":
    key = jax.random.PRNGKey(0)

    # Small shapes consistent with the module (std_sype='mlp_shared').
    batch, obs_dim, act_dim = 8, 8, 4
    hidden_sizes = (32, 32)
    min_log_std, max_log_std = -20.0, 2.0
    # TODO(synk): 'mlp_separated' / 'parameter' std_sype variants and the act_high/low_lim
    # buffers (unused in forward) are not implemented; only the 'mlp_shared' path is fused.

    key, k_obs, k_params = jax.random.split(key, 3)
    obs = jax.random.normal(k_obs, (batch, obs_dim), jnp.float32)
    raw_params = init_params(k_params, obs_dim, act_dim, hidden_sizes)
    packed = pack_params(raw_params)

    out = stocha_policy_forward(obs, packed, act_dim=act_dim,
                                min_log_std=min_log_std, max_log_std=max_log_std)
    jax.block_until_ready(out)

    ref = _reference_forward(obs, raw_params, act_dim, min_log_std, max_log_std)
    assert out.shape == (batch, 2 * act_dim)
    # bf16 MXU inputs with f32 accumulation vs pure-f32 reference -> ~1% relative error.
    assert jnp.allclose(out, ref, atol=3e-2, rtol=3e-2)

    # Second smoke test: multi-step grid (>=2 tiles, ragged last tile, masked writeback).
    key, k_obs2 = jax.random.split(key)
    obs2 = jax.random.normal(k_obs2, (264, obs_dim), jnp.float32)
    out2 = stocha_policy_forward(obs2, packed, act_dim=act_dim,
                                 min_log_std=min_log_std, max_log_std=max_log_std)
    jax.block_until_ready(out2)
    ref2 = _reference_forward(obs2, raw_params, act_dim, min_log_std, max_log_std)
    assert out2.shape == (264, 2 * act_dim)
    assert jnp.allclose(out2, ref2, atol=3e-2, rtol=3e-2)

    print("KERNEL_OK")
</pallas_src>

<mosaic_0001>
module attributes {stable_mosaic.version = 11 : i64} {
  func.func @stocha_policy_kernel(%arg0: i32, %arg1: memref<8x8xf32, #tpu.memory_space<vmem>>, %arg2: memref<8x128xbf16, #tpu.memory_space<vmem>>, %arg3: memref<2x128x128xbf16, #tpu.memory_space<vmem>>, %arg4: memref<3x128xf32, #tpu.memory_space<vmem>>, %arg5: memref<8x8xf32, #tpu.memory_space<vmem>>) attributes {dimension_semantics = [#tpu.dimension_semantics<parallel>], iteration_bounds = array<i64: 1>, scalar_prefetch = 0 : i64, scratch_operands = 0 : i64, tpu.core_type = #tpu.core_type<tc>, window_params = [{transform_indices = @transform_0, window_bounds = array<i64: 8, 8>}, {pipeline_mode = #tpu.pipeline_mode<synchronous>, transform_indices = @transform_1, window_bounds = array<i64: 8, 128>}, {pipeline_mode = #tpu.pipeline_mode<synchronous>, transform_indices = @transform_2, window_bounds = array<i64: 2, 128, 128>}, {pipeline_mode = #tpu.pipeline_mode<synchronous>, transform_indices = @transform_3, window_bounds = array<i64: 3, 128>}, {transform_indices = @transform_4, window_bounds = array<i64: 8, 8>}]} {
    %c0 = arith.constant 0 : index
    %c0_0 = arith.constant 0 : index
    %0 = vector.load %arg1[%c0, %c0_0] : memref<8x8xf32, #tpu.memory_space<vmem>>, vector<8x8xf32>
    %1 = arith.truncf %0 : vector<8x8xf32> to vector<8x8xbf16>
    %c0_1 = arith.constant 0 : index
    %c0_2 = arith.constant 0 : index
    %2 = vector.load %arg2[%c0_1, %c0_2] : memref<8x128xbf16, #tpu.memory_space<vmem>>, vector<8x128xbf16>
    %cst = arith.constant dense<0.000000e+00> : vector<8x128xf32>
    %3 = tpu.matmul %1, %2, %cst {dimension_numbers = #tpu.dot_dimension_numbers<[1], [0], [0], [1], [0, 0, 1, 1], [], []>} : vector<8x8xbf16>, vector<8x128xbf16>, vector<8x128xf32> -> vector<8x128xf32>
    %c0_3 = arith.constant 0 : index
    %c0_4 = arith.constant 0 : index
    %4 = vector.load %arg4[%c0_3, %c0_4] : memref<3x128xf32, #tpu.memory_space<vmem>>, vector<1x128xf32>
    %5 = vector.broadcast %4 : vector<1x128xf32> to vector<8x128xf32>
    %6 = arith.addf %3, %5 : vector<8x128xf32>
    %cst_5 = arith.constant 0.000000e+00 : f32
    %7 = vector.broadcast %cst_5 : f32 to vector<8x128xf32>
    %8 = arith.maximumf %6, %7 : vector<8x128xf32>
    %9 = arith.truncf %8 : vector<8x128xf32> to vector<8x128xbf16>
    %c0_6 = arith.constant 0 : index
    %c0_7 = arith.constant 0 : index
    %c0_8 = arith.constant 0 : index
    %10 = vector.load %arg3[%c0_6, %c0_7, %c0_8] : memref<2x128x128xbf16, #tpu.memory_space<vmem>>, vector<1x128x128xbf16>
    %11 = vector.shape_cast %10 : vector<1x128x128xbf16> to vector<128x128xbf16>
    %cst_9 = arith.constant dense<0.000000e+00> : vector<8x128xf32>
    %12 = tpu.matmul %9, %11, %cst_9 {dimension_numbers = #tpu.dot_dimension_numbers<[1], [0], [0], [1], [0, 0, 1, 1], [], []>} : vector<8x128xbf16>, vector<128x128xbf16>, vector<8x128xf32> -> vector<8x128xf32>
    %c1 = arith.constant 1 : index
    %c0_10 = arith.constant 0 : index
    %13 = vector.load %arg4[%c1, %c0_10] : memref<3x128xf32, #tpu.memory_space<vmem>>, vector<1x128xf32>
    %14 = vector.broadcast %13 : vector<1x128xf32> to vector<8x128xf32>
    %15 = arith.addf %12, %14 : vector<8x128xf32>
    %cst_11 = arith.constant 0.000000e+00 : f32
    %16 = vector.broadcast %cst_11 : f32 to vector<8x128xf32>
    %17 = arith.maximumf %15, %16 : vector<8x128xf32>
    %18 = arith.truncf %17 : vector<8x128xf32> to vector<8x128xbf16>
    %c1_12 = arith.constant 1 : index
    %c0_13 = arith.constant 0 : index
    %c0_14 = arith.constant 0 : index
    %19 = vector.load %arg3[%c1_12, %c0_13, %c0_14] : memref<2x128x128xbf16, #tpu.memory_space<vmem>>, vector<1x128x128xbf16>
    %20 = vector.shape_cast %19 : vector<1x128x128xbf16> to vector<128x128xbf16>
    %cst_15 = arith.constant dense<0.000000e+00> : vector<8x128xf32>
    %21 = tpu.matmul %18, %20, %cst_15 {dimension_numbers = #tpu.dot_dimension_numbers<[1], [0], [0], [1], [0, 0, 1, 1], [], []>} : vector<8x128xbf16>, vector<128x128xbf16>, vector<8x128xf32> -> vector<8x128xf32>
    %c2 = arith.constant 2 : index
    %c0_16 = arith.constant 0 : index
    %22 = vector.load %arg4[%c2, %c0_16] : memref<3x128xf32, #tpu.memory_space<vmem>>, vector<1x128xf32>
    %23 = vector.broadcast %22 : vector<1x128xf32> to vector<8x128xf32>
    %24 = arith.addf %21, %23 : vector<8x128xf32>
    %25 = tpu.iota {dimensions = array<i32: 1>} : vector<8x128xi32>
    %cst_17 = arith.constant -2.000000e+01 : f32
    %cst_18 = arith.constant 2.000000e+00 : f32
    %26 = vector.broadcast %cst_17 : f32 to vector<8x128xf32>
    %27 = arith.maximumf %26, %24 : vector<8x128xf32>
    %28 = vector.broadcast %cst_18 : f32 to vector<8x128xf32>
    %29 = arith.minimumf %28, %27 : vector<8x128xf32>
    %30 = math.exp %29 : vector<8x128xf32>
    %c4_i32 = arith.constant 4 : i32
    %31 = vector.broadcast %c4_i32 : i32 to vector<8x128xi32>
    %32 = arith.cmpi slt, %25, %31 : vector<8x128xi32>
    %33 = arith.select %32, %24, %30 : vector<8x128xi1>, vector<8x128xf32>
    %34 = vector.extract_strided_slice %33 {offsets = [0, 0], sizes = [8, 8], strides = [1, 1]} : vector<8x128xf32> to vector<8x8xf32>
    %c0_19 = arith.constant 0 : index
    %c0_20 = arith.constant 0 : index
    %35 = vector.load %arg5[%c0_19, %c0_20] : memref<8x8xf32, #tpu.memory_space<vmem>>, vector<8x8xf32>
    tpu.vector_store %arg5[%c0_19, %c0_20], %34 {strides = array<i32>} : memref<8x8xf32, #tpu.memory_space<vmem>>, vector<8x8xf32>,
    return
  }
  func.func @transform_0(%arg0: i32) -> (i32, i32) {
    %c0_i32 = arith.constant 0 : i32
    %c0_i32_0 = arith.constant 0 : i32
    return %arg0, %c0_i32 : i32, i32
  }
  func.func @transform_1(%arg0: i32) -> (i32, i32) {
    %c0_i32 = arith.constant 0 : i32
    %c0_i32_0 = arith.constant 0 : i32
    %c0_i32_1 = arith.constant 0 : i32
    return %c0_i32, %c0_i32_0 : i32, i32
  }
  func.func @transform_2(%arg0: i32) -> (i32, i32, i32) {
    %c0_i32 = arith.constant 0 : i32
    %c0_i32_0 = arith.constant 0 : i32
    %c0_i32_1 = arith.constant 0 : i32
    %c0_i32_2 = arith.constant 0 : i32
    return %c0_i32, %c0_i32_0, %c0_i32_1 : i32, i32, i32
  }
  func.func @transform_3(%arg0: i32) -> (i32, i32) {
    %c0_i32 = arith.constant 0 : i32
    %c0_i32_0 = arith.constant 0 : i32
    %c0_i32_1 = arith.constant 0 : i32
    return %c0_i32, %c0_i32_0 : i32, i32
  }
  func.func @transform_4(%arg0: i32) -> (i32, i32) {
    %c0_i32 = arith.constant 0 : i32
    %c0_i32_0 = arith.constant 0 : i32
    return %arg0, %c0_i32 : i32, i32
  }
}

</mosaic_0001>

<bundles_post_ra>
// kernel: tpu_custom_call.1
= control target key start
LH: loop header
LB: loop body
LE: loop exit
PB: predicated region body
PF: predicated region fallthrough
CT: control target
= control target key end

     0   :  { %9 = vsyncpa [#allocation3], 0  ;;  %s563_s0 = inlined_call_operand.hbm [shape: f32[8,8], index: 0, kind: input, shape index: {}]   ;;  %s564_s1 = inlined_call_operand.hbm [shape: bf16[8,128], index: 1, kind: input, shape index: {}]   ;;  %s565_s2 = inlined_call_operand.hbm [shape: bf16[2,128,128], index: 2, kind: input, shape index: {}]   ;;  %s566_s3 = inlined_call_operand.hbm [shape: f32[3,128], index: 3, kind: input, shape index: {}]   ;;  %s567_s4 = inlined_call_operand.hbm [shape: f32[8,8], index: 4, kind: output, shape index: {}]  }
   0x1   :  { %10 = vsyncpa [#allocation6], 0 }
   0x2   :  { %11 = vsyncpa [#allocation9], 0  ;;  %s29_s17 = sshll.u32 %s564_s1, 4  ;;  %s30_s17 = int_to_ptr.hbm [resolvable:$true] %s29_s17 }
   0x3   :  { %12 = vsyncpa [#allocation4], 0  ;;  %s514_s18 = smov [#allocation5]   ;;  %s18_s22 = sshll.u32 %s563_s0, 4  ;;  %s19_s22 = int_to_ptr.hbm [resolvable:$true] %s18_s22 }
   0x4   :  { %s31_s19 = sshll.u32 %s514_s18, 4  ;;  %s515_s23 = smov [#allocation2]   ;;  %s32_s19 = int_to_ptr.vmem [resolvable:$true] %s31_s19 }
   0x5   :  { %34 = dma.hbm_to_vmem [thread:$0]  %s30_s17, 64, %s32_s19, [#allocation6]  }
   0x6   :  { %s20_s24 = sshll.u32 %s515_s23, 4  ;;  %s39_s27 = sshll.u32 %s565_s2, 4  ;;  %s21_s24 = int_to_ptr.vmem [resolvable:$true] %s20_s24  ;;  %s40_s27 = int_to_ptr.hbm [resolvable:$true] %s39_s27 }
   0x7   :  { %23 = dma.hbm_to_vmem [thread:$0]  %s19_s22, 128, %s21_s24, [#allocation3]  }
   0x8   :  { %s516_s1 = smov [#allocation7]   ;;  %s53_s5 = sshll.u32 %s566_s3, 4  ;;  %s54_s5 = int_to_ptr.hbm [resolvable:$true] %s53_s5 }
   0x9   :  { %s41_s28 = sshll.u32 %s516_s1, 4  ;;  %s517_s6 = smov 64   ;;  %s42_s28 = int_to_ptr.vmem [resolvable:$true] %s41_s28 }
   0xa   :  { %s518_s0 = smov 4   ;;  %s519_s7 = smov [#allocation8]  }
   0xb   :  { %47 = dma.hbm_to_vmem [thread:$0]  %s40_s27, 2048, %s42_s28, [#allocation6], %s517_s6, %s517_s6, %s518_s0  }
   0xc   :  { %s55_s8 = sshll.u32 %s519_s7, 4  ;;  %s56_s8 = int_to_ptr.vmem [resolvable:$true] %s55_s8 }
   0xd   :  { %58 = dma.hbm_to_vmem [thread:$0]  %s54_s5, 64, %s56_s8, [#allocation9]  }
   0xe   :  { %506 = dma.done.wait [#allocation3], 128  }
   0xf   :  { %507 = vsyncadd [#allocation3], 4294967168 }
  0x10   :  { %508 = dma.done.wait [#allocation6], 2112  }
  0x11   :  { %509 = vsyncadd [#allocation6], 4294965184 }
  0x12   :  { %510 = dma.done.wait [#allocation9], 64  }
  0x13   :  { %511 = vsyncadd [#allocation9], 4294967232  ;;  %vm85_vm0 = vcmask 1043456   ;;  %v78_v0 = vld [vmem:[#allocation5] sm:$0xf]  ;;  %v76_v1 = vld [vmem:[#allocation2] sm:$0xff]  ;;  %v265_v36 = vlaneseq }
  0x14   :  { %v365_v2 = vld [vmem:[#allocation7 + $0x38] sm:$0xff]  ;;  %v87_v3 = vsel %vm85_vm0, %v78_v0, 0  ;;  %v77_v4 = vpack.c.bf16 %v76_v1, %v76_v1  ;;  %vm81_vm1 = vcmask 64512   ;;  %v364_v5 = vld [vmem:[#allocation7 + $0x30] sm:$0xff]  ;;  %v363_v6 = vld [vmem:[#allocation7 + $0x28] sm:$0xff]  ;;  %s520_s2 = smov [#allocation10]  }
  0x15   :  { %96 = vmatpush.bf16.msra.mxu0 %v87_v3  ;;  %170 = vmatpush.bf16.msra.mxu1 %v365_v2  ;;  %v362_v7 = vld [vmem:[#allocation7 + $0x20] sm:$0xff]  ;;  %v361_v8 = vld [vmem:[#allocation7 + $0x18] sm:$0xff]  ;;  %v360_v9 = vld [vmem:[#allocation7 + $0x10] sm:$0xff]  ;;  %v266_v40 = vand.u32 127, %v265_v36  ;;  %s279_s3 = sshll.u32 %s520_s2, 4  ;;  %s281_s11 = sshll.u32 %s567_s4, 4  ;;  %s280_s3 = int_to_ptr.vmem [resolvable:$true] %s279_s3  ;;  %s282_s11 = int_to_ptr.hbm [resolvable:$true] %s281_s11 }
  0x16   :  { %v359_v10 = vld [vmem:[#allocation7 + $0x8] sm:$0xff]  ;;  %v358_v11 = vld [vmem:[#allocation7] sm:$0xff]  ;;  %v373_v12 = vld [vmem:[#allocation7 + $0x78] sm:$0xff] }
  0x17   :  { %252 = vmatpush.bf16.msra.mxu2 %v373_v12  ;;  %v372_v13 = vld [vmem:[#allocation7 + $0x70] sm:$0xff]  ;;  %v371_v14 = vld [vmem:[#allocation7 + $0x68] sm:$0xff]  ;;  %v370_v15 = vld [vmem:[#allocation7 + $0x60] sm:$0xff]  ;;  %vm271_vm2 = vcmp.lt.s32.totalorder %v266_v40, 4 }
  0x18   :  { %293 = vmatmul.msk.bf16.vlgmr.msra.gmra.mxu0 %vm81_vm1, %v77_v4  ;;  %v369_v16 = vld [vmem:[#allocation7 + $0x58] sm:$0xff]  ;;  %v368_v17 = vld [vmem:[#allocation7 + $0x50] sm:$0xff]  ;;  %v381_v18 = vld [vmem:[#allocation8] ss:$0 sm:$0xff] }
  0x19   :  { %171 = vmatpush.bf16.msra.mxu1 %v364_v5  ;;  %v367_v24 = vld [vmem:[#allocation7 + $0x48] sm:$0xff]  ;;  %v366_v25 = vld [vmem:[#allocation7 + $0x40] sm:$0xff] }
  0x1a   :  { %v382_v26 = vld [vmem:[#allocation8 + $0x1] ss:$0 sm:$0xff]  ;;  %v383_v32 = vld [vmem:[#allocation8 + $0x2] ss:$0 sm:$0xff] }
  0x1b   :  { %253 = vmatpush.bf16.msra.mxu2 %v372_v13 }
  0x1d   :  { %172 = vmatpush.bf16.msra.mxu1 %v363_v6 }
  0x1f   :  { %254 = vmatpush.bf16.msra.mxu2 %v371_v14 }
  0x21   :  { %173 = vmatpush.bf16.msra.mxu1 %v362_v7 }
  0x23   :  { %255 = vmatpush.bf16.msra.mxu2 %v370_v15 }
  0x25   :  { %174 = vmatpush.bf16.msra.mxu1 %v361_v8 }
  0x27   :  { %256 = vmatpush.bf16.msra.mxu2 %v369_v16 }
  0x29   :  { %175 = vmatpush.bf16.msra.mxu1 %v360_v9 }
  0x2b   :  { %257 = vmatpush.bf16.msra.mxu2 %v368_v17 }
  0x2d   :  { %176 = vmatpush.bf16.msra.mxu1 %v359_v10 }
  0x2f   :  { %258 = vmatpush.bf16.msra.mxu2 %v367_v24 }
  0x31   :  { %177 = vmatpush.bf16.msra.mxu1 %v358_v11 }
  0x33   :  { %259 = vmatpush.bf16.msra.mxu2 %v366_v25 }
  0x95   :  { %v98_v19 = vpop.f32.mrf.mxu0 }
  0x96   :  { %v99_v20 = vadd.f32 %v381_v18, %v98_v19 }
  0x98   :  { %v102_v21 = vmax.f32 %v99_v20, 0.0 }
  0x9a   :  { %v103_v22 = vpack.c.bf16 %v102_v21, %v102_v21 }
  0x9c   :  { %178 = vmatmul.bf16.vlgmr.msra.gmra.mxu1 %v103_v22 }
  0x9d   :  { %v100_v23 = vpop.f32.mrf.mxu0 }
 0x119   :  { %v179_v27 = vpop.f32.mrf.mxu1 }
 0x11a   :  { %v180_v28 = vadd.f32 %v382_v26, %v179_v27 }
 0x11c   :  { %v183_v29 = vmax.f32 %v180_v28, 0.0 }
 0x11e   :  { %v184_v30 = vpack.c.bf16 %v183_v29, %v183_v29 }
 0x120   :  { %260 = vmatmul.bf16.vlgmr.msra.gmra.mxu2 %v184_v30 }
 0x121   :  { %v181_v31 = vpop.f32.mrf.mxu1 }
 0x1a3   :  { %v261_v33 = vpop.f32.mrf.mxu2 }
 0x1a4   :  { %v262_v34 = vadd.f32 %v383_v32, %v261_v33 }
 0x1a6   :  { %v267_v35 = vmax.f32 %v262_v34, -20.0 }
 0x1a8   :  { %v268_v37 = vmin.f32 %v267_v35, 2.0 }
 0x1aa   :  { %v269_v38 = vmul.f32 1.442695, %v268_v37 }
 0x1ab   :  { %v263_v39 = vpop.f32.mrf.mxu2 }
 0x1ac   :  { %384 = vpow2.f32 %v269_v38 }
 0x1b2   :  { %v385_v41 = vpop.eup %384 }
 0x1b3   :  { %v272_v42 = vsel %vm271_vm2, %v262_v34, %v385_v41 }
 0x1b4   :  { %273 = vst.msk [vmem:[#allocation10] sm:$0xff] %vm81_vm1, %v272_v42 }
 0x1b5   :  { %284 = dma.vmem_to_hbm [thread:$0]  %s280_s3, 128, %s282_s11, [#allocation4]  }
 0x1b6   :  { %512 = dma.done.wait [#allocation4], 128  }
 0x1b7   :  { %513 = vsyncadd [#allocation4], 4294967168 }
 0x1b8   :  { %289 = vsyncpa [#allocation3], 1 }
 0x1b9   :  { %290 = vsyncpa [#allocation6], 1 }
 0x1ba   :  { %291 = vsyncpa [#allocation9], 1 }
 0x1bb   :  { %292 = vsyncpa [#allocation4], 1 }

</bundles_post_ra>
